<compile_context>
chip_gen: v7x
topology: tpu7x:2x2x1
jax: 0.10.0
libtpu: 0.0.40
codegen_flags: <defaults>
</compile_context>

<pallas_src>
import math

import jax
import jax.numpy as jnp
import numpy as np
from jax.experimental import pallas as pl
from jax.experimental.pallas import tpu as pltpu


def _make_damping_kernel(group):
    """`group` = number of consecutive time steps packed along lanes (>=1)."""

    def kernel(damp_ref, x_ref, out_ref):
        # damp_ref: (Tt, group*D)     batch-invariant per-channel damping block
        # x_ref   : (Bt, D)           the single input time step per batch row
        # out_ref : (Bt, Tt, group*D) lane-dense output block
        x = x_ref[...]
        if group > 1:
            # Replicate the D-wide row `group` times along lanes so the minor
            # (store) dim is lane-dense even when d_model < 128.
            x = jnp.concatenate([x] * group, axis=-1)            # (Bt, group*D)
        out_ref[...] = (x[:, None, :] * damp_ref[...][None, :, :]).astype(out_ref.dtype)

    return kernel


def _pick_blocks(B, Tg, gD, itemsize, target_bytes=4 << 20):
    """Pick (Bt, Tt) so one output block is ~target_bytes: big enough to amortize
    the ~0.35us/grid-step overhead, small enough that the double-buffered output
    block (+ damping block) stays well under the scoped-VMEM default on every
    TPU generation."""
    row_bytes = Tg * gD * itemsize                  # one batch row, all grouped time
    if row_bytes <= target_bytes:
        Tt = Tg                                     # full (grouped) time per block
        Bt = int(max(1, min(B, target_bytes // max(1, row_bytes))))
    else:
        Bt = 1
        tt = max(8, (target_bytes // (gD * itemsize)) // 8 * 8)  # 8-aligned sublanes
        Tt = int(Tg if tt >= Tg else tt)
    return Bt, Tt


def damping_layer_forward(x, damping_param, *, pred_len, nhead, output_attention=False):
    """Pallas implementation of ETSFormer DampingLayer.forward (eval mode).

    x             : (B, 1, D)
    damping_param : (1, nhead)   (the nn.Parameter `_damping_factor`)
    Returns (out (B, pred_len, D), damping (pred_len, nhead) if output_attention else None)
    """
    B, one, D = x.shape
    assert one == 1 and D % nhead == 0
    head_dim = D // nhead

    # ---- batch-invariant precompute (tiny; done once, fuses into surrounding XLA) ----
    r = jax.nn.sigmoid(damping_param.astype(jnp.float32))              # (1, nhead)
    powers = jnp.arange(1, pred_len + 1, dtype=jnp.float32)[:, None]   # (pred_len, 1)
    damping = jnp.cumsum(r ** powers, axis=0)                          # (pred_len, nhead)
    damp_chan = jnp.repeat(damping, head_dim, axis=1)                  # (pred_len, D)

    # Lane-density grouping: pack `group` consecutive time steps along lanes.
    if D >= 128:
        group = 1
    else:
        group = math.gcd(pred_len, max(1, 128 // D))
    Tg = pred_len // group
    gD = group * D
    damp_grp = damp_chan.reshape(Tg, gD).astype(x.dtype)               # (Tg, gD)

    Bt, Tt = _pick_blocks(B, Tg, gD, jnp.dtype(x.dtype).itemsize)
    grid = (pl.cdiv(B, Bt), pl.cdiv(Tg, Tt))

    out_grp = pl.pallas_call(
        _make_damping_kernel(group),
        out_shape=jax.ShapeDtypeStruct((B, Tg, gD), x.dtype),
        grid_spec=pltpu.PrefetchScalarGridSpec(
            num_scalar_prefetch=0,
            grid=grid,
            in_specs=[
                pl.BlockSpec((Tt, gD), lambda b, t: (t, 0)),          # shared damping block
                pl.BlockSpec((Bt, None, D), lambda b, t: (b, 0, 0)),  # x rows, time dim squeezed
            ],
            out_specs=pl.BlockSpec((Bt, Tt, gD), lambda b, t: (b, t, 0)),
        ),
        compiler_params=pltpu.CompilerParams(
            dimension_semantics=("parallel", "parallel")),
    )(damp_grp, x)

    out = out_grp.reshape(B, pred_len, D)      # free (metadata-only) reshape

    if output_attention:
        return out, damping
    return out, None


def _reference(x, damping_param, *, pred_len, nhead):
    """Pure-JAX reference mirroring the PyTorch module (eval mode)."""
    B, _, D = x.shape
    head_dim = D // nhead
    xr = jnp.repeat(x, pred_len, axis=1)                              # (B, T, D)
    r = jax.nn.sigmoid(damping_param)                                 # (1, nhead)
    powers = jnp.arange(1, pred_len + 1, dtype=jnp.float32)[:, None]  # (T, 1)
    damping = jnp.cumsum(r ** powers, axis=0)                         # (T, nhead)
    out = xr.reshape(B, pred_len, nhead, head_dim) * damping[None, :, :, None]
    return out.reshape(B, pred_len, D)


if __name__ == "__main__":
    # small shapes consistent with the module
    B, d_model, nhead, pred_len = 2, 32, 4, 8

    key = jax.random.PRNGKey(0)
    k1, k2 = jax.random.split(key)
    x = jax.random.normal(k1, (B, 1, d_model), dtype=jnp.float32)
    damping_param = jax.random.normal(k2, (1, nhead), dtype=jnp.float32)  # _damping_factor

    out, attn = damping_layer_forward(x, damping_param, pred_len=pred_len, nhead=nhead)
    out = jax.block_until_ready(out)

    out_ref = _reference(x, damping_param, pred_len=pred_len, nhead=nhead)
    np.testing.assert_allclose(np.asarray(out), np.asarray(out_ref), rtol=1e-6, atol=1e-6)
    assert attn is None

    # also exercise the output_attention path once
    out2, attn2 = damping_layer_forward(x, damping_param, pred_len=pred_len,
                                        nhead=nhead, output_attention=True)
    jax.block_until_ready(out2)
    assert attn2.shape == (pred_len, nhead)

    print("KERNEL_OK")
</pallas_src>

<mosaic_0001>
module attributes {stable_mosaic.version = 11 : i64} {
  func.func @kernel(%arg0: i32, %arg1: i32, %arg2: memref<2x128xf32, #tpu.memory_space<vmem>>, %arg3: memref<2x1x32xf32, #tpu.memory_space<vmem>>, %arg4: memref<2x2x128xf32, #tpu.memory_space<vmem>>) attributes {dimension_semantics = [#tpu.dimension_semantics<parallel>, #tpu.dimension_semantics<parallel>], iteration_bounds = array<i64: 1, 1>, scalar_prefetch = 0 : i64, scratch_operands = 0 : i64, tpu.core_type = #tpu.core_type<tc>, window_params = [{transform_indices = @transform_0, window_bounds = array<i64: 2, 128>}, {transform_indices = @transform_1, window_bounds = array<i64: 2, 1, 32>}, {transform_indices = @transform_2, window_bounds = array<i64: 2, 2, 128>}]} {
    %c0 = arith.constant 0 : index
    %c0_0 = arith.constant 0 : index
    %c0_1 = arith.constant 0 : index
    %0 = vector.load %arg3[%c0, %c0_0, %c0_1] : memref<2x1x32xf32, #tpu.memory_space<vmem>>, vector<2x1x32xf32>
    %1 = vector.shape_cast %0 : vector<2x1x32xf32> to vector<2x32xf32>
    %2 = tpu.concatenate %1, %1, %1, %1 in 1 : vector<2x32xf32>, vector<2x32xf32>, vector<2x32xf32>, vector<2x32xf32> -> vector<2x128xf32>
    %3 = vector.shape_cast %2 : vector<2x128xf32> to vector<2x1x128xf32>
    %c0_2 = arith.constant 0 : index
    %c0_3 = arith.constant 0 : index
    %4 = vector.load %arg2[%c0_2, %c0_3] : memref<2x128xf32, #tpu.memory_space<vmem>>, vector<2x128xf32>
    %5 = vector.shape_cast %4 : vector<2x128xf32> to vector<1x2x128xf32>
    %6 = vector.broadcast %3 : vector<2x1x128xf32> to vector<2x2x128xf32>
    %7 = vector.broadcast %5 : vector<1x2x128xf32> to vector<2x2x128xf32>
    %8 = arith.mulf %6, %7 : vector<2x2x128xf32>
    %c0_4 = arith.constant 0 : index
    %c0_5 = arith.constant 0 : index
    %c0_6 = arith.constant 0 : index
    %9 = vector.load %arg4[%c0_4, %c0_5, %c0_6] : memref<2x2x128xf32, #tpu.memory_space<vmem>>, vector<2x2x128xf32>
    tpu.vector_store %arg4[%c0_4, %c0_5, %c0_6], %8 {strides = array<i32>} : memref<2x2x128xf32, #tpu.memory_space<vmem>>, vector<2x2x128xf32>,
    return
  }
  func.func @transform_0(%arg0: i32, %arg1: i32) -> (i32, i32) {
    %c0_i32 = arith.constant 0 : i32
    %c0_i32_0 = arith.constant 0 : i32
    return %arg1, %c0_i32 : i32, i32
  }
  func.func @transform_1(%arg0: i32, %arg1: i32) -> (i32, i32, i32) {
    %c0_i32 = arith.constant 0 : i32
    %c0_i32_0 = arith.constant 0 : i32
    %c0_i32_1 = arith.constant 0 : i32
    return %arg0, %c0_i32, %c0_i32_0 : i32, i32, i32
  }
  func.func @transform_2(%arg0: i32, %arg1: i32) -> (i32, i32, i32) {
    %c0_i32 = arith.constant 0 : i32
    %c0_i32_0 = arith.constant 0 : i32
    return %arg0, %arg1, %c0_i32 : i32, i32, i32
  }
}

</mosaic_0001>

<bundles_post_ra>
// kernel: tpu_custom_call.1
= control target key start
LH: loop header
LB: loop body
LE: loop exit
PB: predicated region body
PF: predicated region fallthrough
CT: control target
= control target key end

     0   :  { %7 = vsyncpa [#allocation3], 0  ;;  %s224_s0 = inlined_call_operand.hbm [shape: f32[2,128], index: 0, kind: input, shape index: {}]   ;;  %s225_s1 = inlined_call_operand.vmem [shape: f32[2,1,32], index: 1, kind: input, shape index: {}]   ;;  %s226_s2 = inlined_call_operand.hbm [shape: f32[2,2,128], index: 2, kind: output, shape index: {}]  }
   0x1   :  { %8 = vsyncpa [#allocation4], 0  ;;  %s169_s9 = smov [#allocation2]   ;;  %s121_s13 = scalar_lea.hbm %s224_s0, 32 }
   0x2   :  { %s15_s10 = sshll.u32 %s169_s9, 4  ;;  %p122_p0 = scmp.ne.s32.totalorder %s224_s0, %s121_s13  ;;  %s16_s10 = int_to_ptr.vmem [resolvable:$true] %s15_s10 }
   0x3   :  { %p125_p1 = scmp.lt.u32.totalorder %s121_s13, %s224_s0 }
   0x5   :  { %p127_p2 = pnand %p125_p1, %p122_p0 }
   0x7   :  { %130 = shalt.err (!%p127_p2)
}
   0x8   :  { %s131_s18 = scalar_lea.vmem %s16_s10, 32  ;;  %p136_p4 = scmp.lt.s32.totalorder %s16_s10, %s16_s10 }
   0x9   :  { %p132_p3 = scmp.ne.s32.totalorder %s16_s10, %s131_s18  ;;  %p137_p5 = scmp.lt.s32.totalorder %s131_s18, %s131_s18 }
   0xb   :  { %p138_p6 = por %p137_p5, %p136_p4 }
   0xd   :  { %p139_p7 = pnand %p138_p6, %p132_p3 }
   0xf   :  { %142 = shalt.err (!%p139_p7)
}
  0x10   :  { %18 = dma.hbm_to_vmem [thread:$0]  %s224_s0, 32, %s16_s10, [#allocation3]  }
  0x11   :  { %165 = dma.done.wait [#allocation3], 32  }
  0x12   :  { %166 = vsyncadd [#allocation3], 4294967264  ;;  %v32_v0 = vlaneseq  ;;  %v170_v1 = vmov 1966171168   ;;  %v24_v6 = vld [vmem:[%s225_s1] sm:$0x1] }
  0x13   :  { %v30_v2 = vunpack.c.l.s4 %v170_v1  ;;  %v25_v7 = vld [vmem:[%s225_s1 + $0x1] sm:$0x1]  ;;  %s171_s0 = smov 32   ;;  %s172_s25 = smov 96   ;;  %vm53_vm0 = vcmask 261120   ;;  %vm55_vm1 = vcmask 523264  }
  0x14   :  { %v33_v3 = vshrl.u32 %v32_v0, 7  ;;  %v28_v8 = vcombine.low %v24_v6, %v25_v7  ;;  %s173_s26 = smov 64   ;;  %vm57_vm2 = vcmask 785408   ;;  %v82_v21 = vld [vmem:[#allocation2] sm:$0x3]  ;;  %s174_s1 = smov [#allocation5]  }
  0x15   :  { %v31_v4 = vunpack.c.0.s8 %v30_v2  ;;  %s102_s27 = sshll.u32 %s174_s1, 4  ;;  %s103_s27 = int_to_ptr.vmem [resolvable:$true] %s102_s27 }
  0x16   :  { %v85_v17 = vsub.s32 0, %v33_v3  ;;  %s143_s28 = scalar_lea.vmem %s103_s27, 64  ;;  %p148_p9 = scmp.lt.s32.totalorder %s103_s27, %s103_s27 }
  0x17   :  { %v34_v5 = vsub.s32 %v31_v4, %v33_v3  ;;  %p144_p8 = scmp.ne.s32.totalorder %s103_s27, %s143_s28  ;;  %p149_p10 = scmp.lt.s32.totalorder %s143_s28, %s143_s28 }
  0x19   :  { %v35_v9 = vrot.slane %v28_v8, %v34_v5  ;;  %p150_p11 = por %p149_p10, %p148_p9 }
  0x1b   :  { %v42_v10 = vrot.slane %v35_v9, %v34_v5  ;;  %p151_p12 = pnand %p150_p11, %p144_p8 }
  0x1d   :  { %44 = vrot.lane.b32.xlu0 %v42_v10, %s171_s0  ;;  %50 = vrot.lane.b32.xlu1 %v42_v10, %s172_s25 }
  0x21   :  { %47 = vrot.lane.b32.xlu0 %v42_v10, %s173_s26 }
  0x8f   :  { %v45_v11 = vpop.permute.xlu0 %44  ;;  %v51_v12 = vpop.permute.xlu1 %50 }
  0x90   :  { %v54_v13 = vsel %vm53_vm0, %v42_v10, %v45_v11 }
  0x93   :  { %v48_v14 = vpop.permute.xlu0 %47 }
  0x94   :  { %v56_v15 = vsel %vm55_vm1, %v54_v13, %v48_v14 }
  0x95   :  { %v58_v16 = vsel %vm57_vm2, %v56_v15, %v51_v12 }
  0x96   :  { %v66_v18 = vrot.slane %v58_v16, %v34_v5 }
  0x98   :  { %v67_v19 = vcombine.high %v66_v18, %v66_v18  ;;  %v74_v20 = vrot.slane %v66_v18, %v34_v5 }
  0x9a   :  { %v81_v22 = vrot.slane %v67_v19, %v34_v5  ;;  %v86_v23 = vrot.slane %v74_v20, %v85_v17 }
  0x9c   :  { %v90_v24 = vrot.slane %v81_v22, %v85_v17  ;;  %v93_v25 = vmul.f32 %v86_v23, %v82_v21 }
  0x9e   :  { %95 = vst [vmem:[#allocation5] sm:$0x3] %v93_v25  ;;  %v94_v26 = vmul.f32 %v90_v24, %v82_v21 }
  0xa0   :  { %96 = vst [vmem:[#allocation5 + $0x2] sm:$0x3] %v94_v26 }
  0xa1   :  { %154 = shalt.err (!%p151_p12)
}
  0xa2   :  { %s155_s3 = scalar_lea.hbm %s226_s2, 64 }
  0xa3   :  { %p156_p13 = scmp.ne.s32.totalorder %s226_s2, %s155_s3  ;;  %p159_p0 = scmp.lt.u32.totalorder %s155_s3, %s226_s2 }
  0xa5   :  { %p161_p1 = pnand %p159_p0, %p156_p13 }
  0xa7   :  { %164 = shalt.err (!%p161_p1)
}
  0xa8   :  { %s175_s8 = smov 2  }
  0xa9   :  { %108 = dma.vmem_to_hbm [thread:$0]  %s103_s27, 64, %s226_s2, [#allocation4], %s171_s0, %s171_s0, %s175_s8  }
  0xaa   :  { %167 = dma.done.wait [#allocation4], 64  }
  0xab   :  { %168 = vsyncadd [#allocation4], 4294967232 }
  0xac   :  { %112 = vsyncpa [#allocation3], 1 }
  0xad   :  { %113 = vsyncpa [#allocation4], 1 }

</bundles_post_ra>
